<compile_context>
chip_gen: v6e
topology: v6e:2x2x1
jax: 0.10.0
libtpu: 0.0.40
codegen_flags: <defaults>
</compile_context>

<pallas_src>
import functools
import math

import jax
import jax.numpy as jnp
from jax.experimental import pallas as pl
from jax.experimental.pallas import tpu as pltpu


def _rotate_lanes(a, off, n):
    """result[:, i] = a[:, (i + off) % n]  (same semantics as the old slice+concat)."""
    if off == 0:
        return a
    if n % 128 == 0:
        # Single XLU lane rotation (np.roll semantics: out[i] = in[(i - shift) % n]).
        return pltpu.roll(a, shift=(-off) % n, axis=1)
    o = off % n
    return jnp.concatenate([a[:, o:], a[:, :o]], axis=1)


# ----------------------------------------------------------------------------
# Fused kernel: AddCoordsTh + "same" KxK conv, one batch element per grid step.
# ----------------------------------------------------------------------------
def _coordconv_kernel(*refs, H, W, K, padding, with_boundary):
    if with_boundary:
        x_ref, hm_ref, coord_ref, mask_ref, w_ref, b_ref, o_ref, last_ref = refs
    else:
        x_ref, coord_ref, mask_ref, w_ref, b_ref, o_ref, last_ref = refs
        hm_ref = None

    # x_ref:    (1, Cin, HW)            input, channels-first, lane-dense
    # hm_ref:   (1, 1,   HW)            last heatmap channel (only if with_boundary)
    # coord_ref:(n_coord, HW)           precomputed xx, yy[, rr] rows (resident)
    # mask_ref: (K*K, HW)               precomputed 0/1 validity masks per tap (resident)
    # w_ref:    (K*K, Cout, Caug)       per-tap weight matrices (resident)
    # b_ref:    (Cout, 1)               bias (resident)
    # o_ref:    (1, Cout, HW)           conv output (lane-dense)
    # last_ref: (1, 2,    HW)           last two augmented channels (lane-dense)
    HW = H * W
    x = x_ref[0]                              # (Cin, HW)
    coord = coord_ref[...]                    # (n_coord, HW)
    masks = mask_ref[...]                     # (K*K, HW) float {0,1}

    rows = [x, coord]
    if with_boundary:
        xx = coord[0:1]                       # (1, HW)
        yy = coord[1:2]
        bc = jnp.clip(hm_ref[0], 0.0, 1.0)    # (1, HW)
        bm = bc > 0.05
        rows.append(jnp.where(bm, xx, 0.0))
        rows.append(jnp.where(bm, yy, 0.0))
    aug = jnp.concatenate(rows, axis=0)       # (Caug, HW)

    # "last_channel": last two augmented rows, full-lane-width stores.
    last_ref[0] = aug[-2:, :].astype(last_ref.dtype)

    # Per-tap accumulation: zero padding is realized by the precomputed masks;
    # no padded intermediate and no im2col patch matrix are ever materialized.
    cout = o_ref.shape[1]
    acc = jnp.zeros((cout, HW), jnp.float32)
    for kh in range(K):
        dh = kh - padding
        for kw in range(K):
            dw = kw - padding
            t = kh * K + kw
            sh = _rotate_lanes(aug, dh * W + dw, HW)        # (Caug, HW)
            sh = sh * masks[t:t + 1, :]                     # boundary -> 0
            acc = acc + jnp.dot(w_ref[t], sh,               # (Cout, HW)
                                preferred_element_type=jnp.float32)
    acc = acc + b_ref[...]                                  # (Cout,1) broadcast
    o_ref[0] = acc.astype(o_ref.dtype)


# ----------------------------------------------------------------------------
# Wrapper: full CoordConvTh.forward (NCHW in / NCHW out, reshapes only).
# ----------------------------------------------------------------------------
@functools.partial(jax.jit, static_argnames=("with_r", "with_boundary", "stride", "padding"))
def coord_conv_th(x_nchw, heatmap_nchw, weight_oihw, bias, *, with_r, with_boundary,
                  stride=1, padding=1):
    B, Cin, H, W = x_nchw.shape
    Cout, Caug, K, _ = weight_oihw.shape
    n_coord = 2 + (1 if with_r else 0)
    assert Caug == Cin + n_coord + (2 if with_boundary else 0)
    assert H > 1 and W > 1, "degenerate H/W would divide by zero in coord normalization"
    # TODO(synk): the fused lane-dense path only covers stride=1 'same' convs
    # (the configuration CoordConvTh is used with here).
    assert stride == 1 and 2 * padding == K - 1

    HW = H * W

    # ---- host-side, grid-invariant precompute (hoisted out of the kernel) ----
    idx = jnp.arange(HW, dtype=jnp.int32)
    hi = idx // W
    wi = idx - hi * W
    xx = hi.astype(jnp.float32) * (2.0 / (H - 1)) - 1.0     # torch xx_channel (varies over H)
    yy = wi.astype(jnp.float32) * (2.0 / (W - 1)) - 1.0
    coord_rows = [xx, yy]
    if with_r:
        rr = jnp.sqrt(xx * xx + yy * yy)
        rr = rr / jnp.max(rr)                 # exact reference semantics (== mul by 1/sqrt(2))
        coord_rows.append(rr)
    coords = jnp.stack(coord_rows, axis=0)                   # (n_coord, HW)

    mask_rows = []
    for kh in range(K):
        dh = kh - padding
        for kw in range(K):
            dw = kw - padding
            valid = ((hi + dh >= 0) & (hi + dh < H) &
                     (wi + dw >= 0) & (wi + dw < W))
            mask_rows.append(valid.astype(jnp.float32))
    masks = jnp.stack(mask_rows, axis=0)                     # (K*K, HW)

    # Glue: pure reshapes (channels already lead in NCHW -> no transposes on x).
    x_flat = x_nchw.reshape(B, Cin, HW).astype(jnp.float32)
    # Per-tap weight matrices, relayout done once host-side:
    # (Cout, Caug, K, K) -> (K*K, Cout, Caug) with w_taps[kh*K+kw] = weight[:, :, kh, kw].
    w_taps = jnp.transpose(weight_oihw, (2, 3, 0, 1)).reshape(K * K, Cout, Caug)
    w_taps = w_taps.astype(jnp.float32)
    b_col = bias.reshape(Cout, 1).astype(jnp.float32)

    inputs = [x_flat]
    in_specs = [pl.BlockSpec((1, Cin, HW), lambda b: (b, 0, 0))]
    if with_boundary:
        hm_flat = heatmap_nchw[:, -1:, :, :].reshape(B, 1, HW).astype(jnp.float32)
        inputs.append(hm_flat)
        in_specs.append(pl.BlockSpec((1, 1, HW), lambda b: (b, 0, 0)))
    inputs += [coords, masks, w_taps, b_col]
    in_specs += [pl.BlockSpec((n_coord, HW), lambda b: (0, 0)),          # resident coords
                 pl.BlockSpec((K * K, HW), lambda b: (0, 0)),            # resident masks
                 pl.BlockSpec((K * K, Cout, Caug), lambda b: (0, 0, 0)), # resident weights
                 pl.BlockSpec((Cout, 1), lambda b: (0, 0))]              # resident bias

    kernel = functools.partial(_coordconv_kernel, H=H, W=W, K=K, padding=padding,
                               with_boundary=with_boundary)

    out_flat, last_flat = pl.pallas_call(
        kernel,
        out_shape=(jax.ShapeDtypeStruct((B, Cout, HW), jnp.float32),
                   jax.ShapeDtypeStruct((B, 2, HW), jnp.float32)),
        grid=(B,),
        in_specs=in_specs,
        out_specs=(pl.BlockSpec((1, Cout, HW), lambda b: (b, 0, 0)),
                   pl.BlockSpec((1, 2, HW), lambda b: (b, 0, 0))),
        compiler_params=pltpu.CompilerParams(dimension_semantics=("parallel",)),
    )(*inputs)

    # Glue: free reshapes back to NCHW.
    return out_flat.reshape(B, Cout, H, W), last_flat.reshape(B, 2, H, W)


# ----------------------------------------------------------------------------
# Pure-JAX reference (mirrors the PyTorch forward exactly) for validation.
# ----------------------------------------------------------------------------
def _reference(x, heatmap, w, b, *, with_r, with_boundary, stride, padding):
    B, C, H, W = x.shape
    xx = jnp.broadcast_to(jnp.arange(H, dtype=jnp.float32)[None, None, :, None], (B, 1, H, W))
    yy = jnp.broadcast_to(jnp.arange(W, dtype=jnp.float32)[None, None, None, :], (B, 1, H, W))
    xx = xx / (H - 1) * 2.0 - 1.0
    yy = yy / (W - 1) * 2.0 - 1.0
    ret = jnp.concatenate([x, xx, yy], axis=1)
    if with_r:
        rr = jnp.sqrt(xx ** 2 + yy ** 2)
        rr = rr / jnp.max(rr)
        ret = jnp.concatenate([ret, rr], axis=1)
    if with_boundary:
        bc = jnp.clip(heatmap[:, -1:, :, :], 0.0, 1.0)
        xx_b = jnp.where(bc > 0.05, xx, jnp.zeros_like(xx))
        yy_b = jnp.where(bc > 0.05, yy, jnp.zeros_like(yy))
        ret = jnp.concatenate([ret, xx_b, yy_b], axis=1)
    last = ret[:, -2:, :, :]
    out = jax.lax.conv_general_dilated(
        ret, w, (stride, stride), [(padding, padding)] * 2,
        dimension_numbers=("NCHW", "OIHW", "NCHW"))
    out = out + b[None, :, None, None]
    return out, last


if __name__ == "__main__":
    # Module config: CoordConvTh(x_dim=16, y_dim=16, with_r=True, with_boundary=True,
    #                            in_channels=4, first_one=False,
    #                            out_channels=8, kernel_size=3, stride=1, padding=1)
    B, Cin, H, W = 2, 4, 16, 16
    with_r, with_boundary, first_one = True, True, False
    Cout, K, stride, padding = 8, 3, 1, 1
    Caug = Cin + 2 + (1 if with_r else 0) + (2 if with_boundary and not first_one else 0)

    key = jax.random.PRNGKey(0)
    kx, kh, kw, kb = jax.random.split(key, 4)
    x = jax.random.normal(kx, (B, Cin, H, W), jnp.float32)
    heatmap = jax.random.uniform(kh, (B, 3, H, W), jnp.float32)          # values in [0,1)
    weight = jax.random.normal(kw, (Cout, Caug, K, K), jnp.float32) * 0.1
    bias = jax.random.normal(kb, (Cout,), jnp.float32) * 0.1

    out, last = coord_conv_th(x, heatmap, weight, bias,
                              with_r=with_r, with_boundary=with_boundary,
                              stride=stride, padding=padding)
    jax.block_until_ready((out, last))

    out_ref, last_ref = _reference(x, heatmap, weight, bias,
                                   with_r=with_r, with_boundary=with_boundary,
                                   stride=stride, padding=padding)

    assert out.shape == (B, Cout, H, W) and last.shape == (B, 2, H, W)
    assert jnp.allclose(out, out_ref, atol=1e-4, rtol=1e-4)
    assert jnp.allclose(last, last_ref, atol=1e-5, rtol=1e-5)
    print("KERNEL_OK")
</pallas_src>

<mosaic_0001>
module attributes {stable_mosaic.version = 11 : i64} {
  func.func @_coordconv_kernel(%arg0: i32, %arg1: memref<1x4x256xf32, #tpu.memory_space<vmem>>, %arg2: memref<1x1x256xf32, #tpu.memory_space<vmem>>, %arg3: memref<3x256xf32, #tpu.memory_space<vmem>>, %arg4: memref<9x256xf32, #tpu.memory_space<vmem>>, %arg5: memref<9x8x9xf32, #tpu.memory_space<vmem>>, %arg6: memref<8x1xf32, #tpu.memory_space<vmem>>, %arg7: memref<1x8x256xf32, #tpu.memory_space<vmem>>, %arg8: memref<1x2x256xf32, #tpu.memory_space<vmem>>) attributes {dimension_semantics = [#tpu.dimension_semantics<parallel>], iteration_bounds = array<i64: 2>, scalar_prefetch = 0 : i64, scratch_operands = 0 : i64, tpu.core_type = #tpu.core_type<tc>, window_params = [{transform_indices = @transform_0, window_bounds = array<i64: 1, 4, 256>}, {transform_indices = @transform_1, window_bounds = array<i64: 1, 1, 256>}, {pipeline_mode = #tpu.pipeline_mode<synchronous>, transform_indices = @transform_2, window_bounds = array<i64: 3, 256>}, {pipeline_mode = #tpu.pipeline_mode<synchronous>, transform_indices = @transform_3, window_bounds = array<i64: 9, 256>}, {pipeline_mode = #tpu.pipeline_mode<synchronous>, transform_indices = @transform_4, window_bounds = array<i64: 9, 8, 9>}, {pipeline_mode = #tpu.pipeline_mode<synchronous>, transform_indices = @transform_5, window_bounds = array<i64: 8, 1>}, {transform_indices = @transform_6, window_bounds = array<i64: 1, 8, 256>}, {transform_indices = @transform_7, window_bounds = array<i64: 1, 2, 256>}]} {
    %c0 = arith.constant 0 : index
    %c0_0 = arith.constant 0 : index
    %c0_1 = arith.constant 0 : index
    %0 = vector.load %arg1[%c0, %c0_0, %c0_1] : memref<1x4x256xf32, #tpu.memory_space<vmem>>, vector<1x4x256xf32>
    %1 = vector.shape_cast %0 : vector<1x4x256xf32> to vector<4x256xf32>
    %c0_2 = arith.constant 0 : index
    %c0_3 = arith.constant 0 : index
    %2 = vector.load %arg3[%c0_2, %c0_3] : memref<3x256xf32, #tpu.memory_space<vmem>>, vector<3x256xf32>
    %c0_4 = arith.constant 0 : index
    %c0_5 = arith.constant 0 : index
    %3 = vector.load %arg4[%c0_4, %c0_5] : memref<9x256xf32, #tpu.memory_space<vmem>>, vector<9x256xf32>
    %4 = vector.extract_strided_slice %2 {offsets = [0, 0], sizes = [1, 256], strides = [1, 1]} : vector<3x256xf32> to vector<1x256xf32>
    %5 = vector.extract_strided_slice %2 {offsets = [1, 0], sizes = [1, 256], strides = [1, 1]} : vector<3x256xf32> to vector<1x256xf32>
    %c0_6 = arith.constant 0 : index
    %c0_7 = arith.constant 0 : index
    %c0_8 = arith.constant 0 : index
    %6 = vector.load %arg2[%c0_6, %c0_7, %c0_8] : memref<1x1x256xf32, #tpu.memory_space<vmem>>, vector<1x1x256xf32>
    %7 = vector.shape_cast %6 : vector<1x1x256xf32> to vector<1x256xf32>
    %cst = arith.constant 0.000000e+00 : f32
    %cst_9 = arith.constant 1.000000e+00 : f32
    %8 = vector.broadcast %cst : f32 to vector<1x256xf32>
    %9 = arith.maximumf %8, %7 : vector<1x256xf32>
    %10 = vector.broadcast %cst_9 : f32 to vector<1x256xf32>
    %11 = arith.minimumf %10, %9 : vector<1x256xf32>
    %cst_10 = arith.constant 5.000000e-02 : f32
    %12 = vector.broadcast %cst_10 : f32 to vector<1x256xf32>
    %13 = arith.cmpf ogt, %11, %12 : vector<1x256xf32>
    %cst_11 = arith.constant 0.000000e+00 : f32
    %14 = vector.broadcast %cst_11 : f32 to vector<1x256xf32>
    %15 = arith.select %13, %4, %14 : vector<1x256xi1>, vector<1x256xf32>
    %cst_12 = arith.constant 0.000000e+00 : f32
    %16 = vector.broadcast %cst_12 : f32 to vector<1x256xf32>
    %17 = arith.select %13, %5, %16 : vector<1x256xi1>, vector<1x256xf32>
    %18 = tpu.concatenate %1, %2, %15, %17 in 0 : vector<4x256xf32>, vector<3x256xf32>, vector<1x256xf32>, vector<1x256xf32> -> vector<9x256xf32>
    %19 = vector.extract_strided_slice %18 {offsets = [7, 0], sizes = [2, 256], strides = [1, 1]} : vector<9x256xf32> to vector<2x256xf32>
    %c0_13 = arith.constant 0 : index
    %c0_14 = arith.constant 0 : index
    %c0_15 = arith.constant 0 : index
    %20 = vector.load %arg8[%c0_13, %c0_14, %c0_15] : memref<1x2x256xf32, #tpu.memory_space<vmem>>, vector<1x2x256xf32>
    %21 = vector.shape_cast %20 : vector<1x2x256xf32> to vector<2x256xf32>
    %22 = vector.shape_cast %19 : vector<2x256xf32> to vector<1x2x256xf32>
    tpu.vector_store %arg8[%c0_13, %c0_14, %c0_15], %22 {strides = array<i32>} : memref<1x2x256xf32, #tpu.memory_space<vmem>>, vector<1x2x256xf32>,
    %cst_16 = arith.constant 0.000000e+00 : f32
    %23 = vector.broadcast %cst_16 : f32 to vector<8x256xf32>
    %c17_i32 = arith.constant 17 : i32
    %24 = tpu.dynamic_rotate %18 by %c17_i32 dim 1 : vector<9x256xf32>, i32 -> vector<9x256xf32>
    %25 = vector.extract_strided_slice %3 {offsets = [0, 0], sizes = [1, 256], strides = [1, 1]} : vector<9x256xf32> to vector<1x256xf32>
    %26 = vector.broadcast %25 : vector<1x256xf32> to vector<9x256xf32>
    %27 = arith.mulf %24, %26 : vector<9x256xf32>
    %c0_17 = arith.constant 0 : index
    %c0_18 = arith.constant 0 : index
    %c0_19 = arith.constant 0 : index
    %28 = vector.load %arg5[%c0_17, %c0_18, %c0_19] : memref<9x8x9xf32, #tpu.memory_space<vmem>>, vector<1x8x9xf32>
    %29 = vector.shape_cast %28 : vector<1x8x9xf32> to vector<8x9xf32>
    %cst_20 = arith.constant dense<0.000000e+00> : vector<8x256xf32>
    %30 = tpu.matmul %29, %27, %cst_20 {dimension_numbers = #tpu.dot_dimension_numbers<[1], [0], [0], [1], [0, 0, 1, 1], [], []>} : vector<8x9xf32>, vector<9x256xf32>, vector<8x256xf32> -> vector<8x256xf32>
    %31 = arith.addf %23, %30 : vector<8x256xf32>
    %c16_i32 = arith.constant 16 : i32
    %32 = tpu.dynamic_rotate %18 by %c16_i32 dim 1 : vector<9x256xf32>, i32 -> vector<9x256xf32>
    %33 = vector.extract_strided_slice %3 {offsets = [1, 0], sizes = [1, 256], strides = [1, 1]} : vector<9x256xf32> to vector<1x256xf32>
    %34 = vector.broadcast %33 : vector<1x256xf32> to vector<9x256xf32>
    %35 = arith.mulf %32, %34 : vector<9x256xf32>
    %c1 = arith.constant 1 : index
    %c0_21 = arith.constant 0 : index
    %c0_22 = arith.constant 0 : index
    %36 = vector.load %arg5[%c1, %c0_21, %c0_22] : memref<9x8x9xf32, #tpu.memory_space<vmem>>, vector<1x8x9xf32>
    %37 = vector.shape_cast %36 : vector<1x8x9xf32> to vector<8x9xf32>
    %cst_23 = arith.constant dense<0.000000e+00> : vector<8x256xf32>
    %38 = tpu.matmul %37, %35, %cst_23 {dimension_numbers = #tpu.dot_dimension_numbers<[1], [0], [0], [1], [0, 0, 1, 1], [], []>} : vector<8x9xf32>, vector<9x256xf32>, vector<8x256xf32> -> vector<8x256xf32>
    %39 = arith.addf %31, %38 : vector<8x256xf32>
    %c15_i32 = arith.constant 15 : i32
    %40 = tpu.dynamic_rotate %18 by %c15_i32 dim 1 : vector<9x256xf32>, i32 -> vector<9x256xf32>
    %41 = vector.extract_strided_slice %3 {offsets = [2, 0], sizes = [1, 256], strides = [1, 1]} : vector<9x256xf32> to vector<1x256xf32>
    %42 = vector.broadcast %41 : vector<1x256xf32> to vector<9x256xf32>
    %43 = arith.mulf %40, %42 : vector<9x256xf32>
    %c2 = arith.constant 2 : index
    %c0_24 = arith.constant 0 : index
    %c0_25 = arith.constant 0 : index
    %44 = vector.load %arg5[%c2, %c0_24, %c0_25] : memref<9x8x9xf32, #tpu.memory_space<vmem>>, vector<1x8x9xf32>
    %45 = vector.shape_cast %44 : vector<1x8x9xf32> to vector<8x9xf32>
    %cst_26 = arith.constant dense<0.000000e+00> : vector<8x256xf32>
    %46 = tpu.matmul %45, %43, %cst_26 {dimension_numbers = #tpu.dot_dimension_numbers<[1], [0], [0], [1], [0, 0, 1, 1], [], []>} : vector<8x9xf32>, vector<9x256xf32>, vector<8x256xf32> -> vector<8x256xf32>
    %47 = arith.addf %39, %46 : vector<8x256xf32>
    %c1_i32 = arith.constant 1 : i32
    %48 = tpu.dynamic_rotate %18 by %c1_i32 dim 1 : vector<9x256xf32>, i32 -> vector<9x256xf32>
    %49 = vector.extract_strided_slice %3 {offsets = [3, 0], sizes = [1, 256], strides = [1, 1]} : vector<9x256xf32> to vector<1x256xf32>
    %50 = vector.broadcast %49 : vector<1x256xf32> to vector<9x256xf32>
    %51 = arith.mulf %48, %50 : vector<9x256xf32>
    %c3 = arith.constant 3 : index
    %c0_27 = arith.constant 0 : index
    %c0_28 = arith.constant 0 : index
    %52 = vector.load %arg5[%c3, %c0_27, %c0_28] : memref<9x8x9xf32, #tpu.memory_space<vmem>>, vector<1x8x9xf32>
    %53 = vector.shape_cast %52 : vector<1x8x9xf32> to vector<8x9xf32>
    %cst_29 = arith.constant dense<0.000000e+00> : vector<8x256xf32>
    %54 = tpu.matmul %53, %51, %cst_29 {dimension_numbers = #tpu.dot_dimension_numbers<[1], [0], [0], [1], [0, 0, 1, 1], [], []>} : vector<8x9xf32>, vector<9x256xf32>, vector<8x256xf32> -> vector<8x256xf32>
    %55 = arith.addf %47, %54 : vector<8x256xf32>
    %56 = vector.extract_strided_slice %3 {offsets = [4, 0], sizes = [1, 256], strides = [1, 1]} : vector<9x256xf32> to vector<1x256xf32>
    %57 = vector.broadcast %56 : vector<1x256xf32> to vector<9x256xf32>
    %58 = arith.mulf %18, %57 : vector<9x256xf32>
    %c4 = arith.constant 4 : index
    %c0_30 = arith.constant 0 : index
    %c0_31 = arith.constant 0 : index
    %59 = vector.load %arg5[%c4, %c0_30, %c0_31] : memref<9x8x9xf32, #tpu.memory_space<vmem>>, vector<1x8x9xf32>
    %60 = vector.shape_cast %59 : vector<1x8x9xf32> to vector<8x9xf32>
    %cst_32 = arith.constant dense<0.000000e+00> : vector<8x256xf32>
    %61 = tpu.matmul %60, %58, %cst_32 {dimension_numbers = #tpu.dot_dimension_numbers<[1], [0], [0], [1], [0, 0, 1, 1], [], []>} : vector<8x9xf32>, vector<9x256xf32>, vector<8x256xf32> -> vector<8x256xf32>
    %62 = arith.addf %55, %61 : vector<8x256xf32>
    %c255_i32 = arith.constant 255 : i32
    %63 = tpu.dynamic_rotate %18 by %c255_i32 dim 1 : vector<9x256xf32>, i32 -> vector<9x256xf32>
    %64 = vector.extract_strided_slice %3 {offsets = [5, 0], sizes = [1, 256], strides = [1, 1]} : vector<9x256xf32> to vector<1x256xf32>
    %65 = vector.broadcast %64 : vector<1x256xf32> to vector<9x256xf32>
    %66 = arith.mulf %63, %65 : vector<9x256xf32>
    %c5 = arith.constant 5 : index
    %c0_33 = arith.constant 0 : index
    %c0_34 = arith.constant 0 : index
    %67 = vector.load %arg5[%c5, %c0_33, %c0_34] : memref<9x8x9xf32, #tpu.memory_space<vmem>>, vector<1x8x9xf32>
    %68 = vector.shape_cast %67 : vector<1x8x9xf32> to vector<8x9xf32>
    %cst_35 = arith.constant dense<0.000000e+00> : vector<8x256xf32>
    %69 = tpu.matmul %68, %66, %cst_35 {dimension_numbers = #tpu.dot_dimension_numbers<[1], [0], [0], [1], [0, 0, 1, 1], [], []>} : vector<8x9xf32>, vector<9x256xf32>, vector<8x256xf32> -> vector<8x256xf32>
    %70 = arith.addf %62, %69 : vector<8x256xf32>
    %c241_i32 = arith.constant 241 : i32
    %71 = tpu.dynamic_rotate %18 by %c241_i32 dim 1 : vector<9x256xf32>, i32 -> vector<9x256xf32>
    %72 = vector.extract_strided_slice %3 {offsets = [6, 0], sizes = [1, 256], strides = [1, 1]} : vector<9x256xf32> to vector<1x256xf32>
    %73 = vector.broadcast %72 : vector<1x256xf32> to vector<9x256xf32>
    %74 = arith.mulf %71, %73 : vector<9x256xf32>
    %c6 = arith.constant 6 : index
    %c0_36 = arith.constant 0 : index
    %c0_37 = arith.constant 0 : index
    %75 = vector.load %arg5[%c6, %c0_36, %c0_37] : memref<9x8x9xf32, #tpu.memory_space<vmem>>, vector<1x8x9xf32>
    %76 = vector.shape_cast %75 : vector<1x8x9xf32> to vector<8x9xf32>
    %cst_38 = arith.constant dense<0.000000e+00> : vector<8x256xf32>
    %77 = tpu.matmul %76, %74, %cst_38 {dimension_numbers = #tpu.dot_dimension_numbers<[1], [0], [0], [1], [0, 0, 1, 1], [], []>} : vector<8x9xf32>, vector<9x256xf32>, vector<8x256xf32> -> vector<8x256xf32>
    %78 = arith.addf %70, %77 : vector<8x256xf32>
    %c240_i32 = arith.constant 240 : i32
    %79 = tpu.dynamic_rotate %18 by %c240_i32 dim 1 : vector<9x256xf32>, i32 -> vector<9x256xf32>
    %80 = vector.extract_strided_slice %3 {offsets = [7, 0], sizes = [1, 256], strides = [1, 1]} : vector<9x256xf32> to vector<1x256xf32>
    %81 = vector.broadcast %80 : vector<1x256xf32> to vector<9x256xf32>
    %82 = arith.mulf %79, %81 : vector<9x256xf32>
    %c7 = arith.constant 7 : index
    %c0_39 = arith.constant 0 : index
    %c0_40 = arith.constant 0 : index
    %83 = vector.load %arg5[%c7, %c0_39, %c0_40] : memref<9x8x9xf32, #tpu.memory_space<vmem>>, vector<1x8x9xf32>
    %84 = vector.shape_cast %83 : vector<1x8x9xf32> to vector<8x9xf32>
    %cst_41 = arith.constant dense<0.000000e+00> : vector<8x256xf32>
    %85 = tpu.matmul %84, %82, %cst_41 {dimension_numbers = #tpu.dot_dimension_numbers<[1], [0], [0], [1], [0, 0, 1, 1], [], []>} : vector<8x9xf32>, vector<9x256xf32>, vector<8x256xf32> -> vector<8x256xf32>
    %86 = arith.addf %78, %85 : vector<8x256xf32>
    %c239_i32 = arith.constant 239 : i32
    %87 = tpu.dynamic_rotate %18 by %c239_i32 dim 1 : vector<9x256xf32>, i32 -> vector<9x256xf32>
    %88 = vector.extract_strided_slice %3 {offsets = [8, 0], sizes = [1, 256], strides = [1, 1]} : vector<9x256xf32> to vector<1x256xf32>
    %89 = vector.broadcast %88 : vector<1x256xf32> to vector<9x256xf32>
    %90 = arith.mulf %87, %89 : vector<9x256xf32>
    %c8 = arith.constant 8 : index
    %c0_42 = arith.constant 0 : index
    %c0_43 = arith.constant 0 : index
    %91 = vector.load %arg5[%c8, %c0_42, %c0_43] : memref<9x8x9xf32, #tpu.memory_space<vmem>>, vector<1x8x9xf32>
    %92 = vector.shape_cast %91 : vector<1x8x9xf32> to vector<8x9xf32>
    %cst_44 = arith.constant dense<0.000000e+00> : vector<8x256xf32>
    %93 = tpu.matmul %92, %90, %cst_44 {dimension_numbers = #tpu.dot_dimension_numbers<[1], [0], [0], [1], [0, 0, 1, 1], [], []>} : vector<8x9xf32>, vector<9x256xf32>, vector<8x256xf32> -> vector<8x256xf32>
    %94 = arith.addf %86, %93 : vector<8x256xf32>
    %c0_45 = arith.constant 0 : index
    %c0_46 = arith.constant 0 : index
    %95 = vector.load %arg6[%c0_45, %c0_46] : memref<8x1xf32, #tpu.memory_space<vmem>>, vector<8x1xf32>
    %96 = vector.broadcast %95 : vector<8x1xf32> to vector<8x256xf32>
    %97 = arith.addf %94, %96 : vector<8x256xf32>
    %c0_47 = arith.constant 0 : index
    %c0_48 = arith.constant 0 : index
    %c0_49 = arith.constant 0 : index
    %98 = vector.load %arg7[%c0_47, %c0_48, %c0_49] : memref<1x8x256xf32, #tpu.memory_space<vmem>>, vector<1x8x256xf32>
    %99 = vector.shape_cast %98 : vector<1x8x256xf32> to vector<8x256xf32>
    %100 = vector.shape_cast %97 : vector<8x256xf32> to vector<1x8x256xf32>
    tpu.vector_store %arg7[%c0_47, %c0_48, %c0_49], %100 {strides = array<i32>} : memref<1x8x256xf32, #tpu.memory_space<vmem>>, vector<1x8x256xf32>,
    return
  }
  func.func @transform_0(%arg0: i32) -> (i32, i32, i32) {
    %c0_i32 = arith.constant 0 : i32
    %c0_i32_0 = arith.constant 0 : i32
    %c0_i32_1 = arith.constant 0 : i32
    return %arg0, %c0_i32, %c0_i32_0 : i32, i32, i32
  }
  func.func @transform_1(%arg0: i32) -> (i32, i32, i32) {
    %c0_i32 = arith.constant 0 : i32
    %c0_i32_0 = arith.constant 0 : i32
    %c0_i32_1 = arith.constant 0 : i32
    return %arg0, %c0_i32, %c0_i32_0 : i32, i32, i32
  }
  func.func @transform_2(%arg0: i32) -> (i32, i32) {
    %c0_i32 = arith.constant 0 : i32
    %c0_i32_0 = arith.constant 0 : i32
    %c0_i32_1 = arith.constant 0 : i32
    return %c0_i32, %c0_i32_0 : i32, i32
  }
  func.func @transform_3(%arg0: i32) -> (i32, i32) {
    %c0_i32 = arith.constant 0 : i32
    %c0_i32_0 = arith.constant 0 : i32
    %c0_i32_1 = arith.constant 0 : i32
    return %c0_i32, %c0_i32_0 : i32, i32
  }
  func.func @transform_4(%arg0: i32) -> (i32, i32, i32) {
    %c0_i32 = arith.constant 0 : i32
    %c0_i32_0 = arith.constant 0 : i32
    %c0_i32_1 = arith.constant 0 : i32
    %c0_i32_2 = arith.constant 0 : i32
    return %c0_i32, %c0_i32_0, %c0_i32_1 : i32, i32, i32
  }
  func.func @transform_5(%arg0: i32) -> (i32, i32) {
    %c0_i32 = arith.constant 0 : i32
    %c0_i32_0 = arith.constant 0 : i32
    %c0_i32_1 = arith.constant 0 : i32
    return %c0_i32, %c0_i32_0 : i32, i32
  }
  func.func @transform_6(%arg0: i32) -> (i32, i32, i32) {
    %c0_i32 = arith.constant 0 : i32
    %c0_i32_0 = arith.constant 0 : i32
    %c0_i32_1 = arith.constant 0 : i32
    return %arg0, %c0_i32, %c0_i32_0 : i32, i32, i32
  }
  func.func @transform_7(%arg0: i32) -> (i32, i32, i32) {
    %c0_i32 = arith.constant 0 : i32
    %c0_i32_0 = arith.constant 0 : i32
    %c0_i32_1 = arith.constant 0 : i32
    return %arg0, %c0_i32, %c0_i32_0 : i32, i32, i32
  }
}

</mosaic_0001>

<bundles_post_ra>
// kernel: coord_conv_th.1
= control target key start
LH: loop header
LB: loop body
LE: loop exit
PB: predicated region body
PF: predicated region fallthrough
CT: control target
= control target key end

     0   :  { %s1625_s24 = smov 0   ;;  %s1916_s0 = inlined_call_operand.vmem [shape: f32[2,4,256], index: 0, kind: input, shape index: {}]   ;;  %s1917_s1 = inlined_call_operand.vmem [shape: f32[2,1,256], index: 1, kind: input, shape index: {}]   ;;  %s1918_s2 = inlined_call_operand.vmem [shape: f32[3,256], index: 2, kind: input, shape index: {}]   ;;  %s1919_s3 = inlined_call_operand.vmem [shape: f32[9,256], index: 3, kind: input, shape index: {}]   ;;  %s1920_s4 = inlined_call_operand.vmem [shape: f32[9,8,9], index: 4, kind: input, shape index: {}]   ;;  %s1921_s5 = inlined_call_operand.vmem [shape: f32[8,1], index: 5, kind: input, shape index: {}]   ;;  %s1922_s6 = inlined_call_operand.vmem [shape: f32[2,8,256], index: 6, kind: output, shape index: {0}]   ;;  %s1923_s7 = inlined_call_operand.vmem [shape: f32[2,2,256], index: 7, kind: output, shape index: {1}]  }
   0x1 LB: > { %s1487_s25 = sadd.s32 4294967295, %s1571_s24   ;;  %p1491_p0 = scmp.ge.s32.totalorder %s1571_s24, 1  ;;  %s1571_s24 = sphi %s1625_s24, %s18_s24  }
   0x2   : > { %p249_p1 = scmp.lt.s32.totalorder %s1571_s24, 3 }
   0x4   : > { %p250_p2 = pnand %p1491_p0, %p249_p1 }
   0x5   : > { %p290_p3 = scmp.lt.s32.totalorder (!%p250_p2), %s1487_s25, 1  ;;  %s1575_s13 = smov (!%p250_p2), 17  }
   0x6   : > { %253 = sbr.rel (%p250_p2) target bundleno = 407 (0x197), region = 44  ;;  %s1576_s14 = smov (!%p250_p2), 16  }
   0x7   : > { %s1578_s19 = smov (!%p250_p2), 15   ;;  %s1580_s27 = smov (!%p250_p2), 127  }
   0x8   : > { %s1581_s28 = smov (!%p250_p2), 113   ;;  %s1584_s30 = smov (!%p250_p2), 111  }
   0xb   : > { %v323_v0 = vlaneseq  ;;  %v1573_v1 = vmov 1966171168   ;;  %s1925_s25 = smov (!%p290_p3, %s1487_s25), 1  ;;  %v310_v5 = vld [vmem:[%s1918_s2] sm:$0x77]  ;;  %vm373_vm0 = vcmask 1043456  }
   0xc   : > { %v321_v2 = vunpack.c.l.s4 %v1573_v1  ;;  %s1494_s26 = sshll.u32 %s1925_s25, 1  ;;  %s1539_s29 = sshll.u32 %s1925_s25, 3  ;;  %v1574_v9 = vmov 1983009808   ;;  %v349_v13 = vcombine.low %v310_v5, %v310_v5  ;;  %vm376_vm2 = vcmask 1046528   ;;  %v1696_v43 = vld [vmem:[%s1919_s3 + $0x8] sm:$0xff] }
   0xd   : > { %v1636_v3 = vshrl.u32 %v323_v0, 7  ;;  %s298_s9 = scalar_lea.vmem %s1917_s1, %s1494_s26  ;;  %s294_s12 = scalar_lea.vmem %s1916_s0, %s1539_s29  ;;  %v383_v10 = vunpack.c.l.s4 %v1574_v9  ;;  %vm399_vm3 = vcmask 1042434   ;;  %vm398_vm4 = vcmask 1040384   ;;  %v1701_v44 = vld [vmem:[%s1919_s3] sm:$0xff] }
   0xe   : > { %v322_v4 = vunpack.c.0.s8 %v321_v2  ;;  %v315_v7 = vld [vmem:[%s298_s9] sm:$0x3]  ;;  %vm400_vm5 = vmor %vm398_vm4, %vm399_vm3  ;;  %vm401_vm6 = vcmask 1044484   ;;  %vm403_vm8 = vcmask 1046534   ;;  %s1541_s15 = sshll.u32 %s1925_s25, 2  ;;  %v1577_v39 = vmov 0.0  }
   0xf   : > { %v309_v8 = vld [vmem:[%s294_s12] sm:$0xff]  ;;  %v316_v11 = vmax.f32 %v315_v7, 0.0  ;;  %v1651_v18 = vsub.s32 0, %v1636_v3  ;;  %v1654_v19 = vsub.s32 1, %v1636_v3  ;;  %v384_v20 = vunpack.c.0.s8 %v383_v10  ;;  %vm402_vm7 = vmor %vm400_vm5, %vm401_vm6  ;;  %540 = vmatprep.mubr.f32.mxu0 %v1577_v39  ;;  %620 = vmatprep.mubr.f32.mxu1 %v1577_v39  ;;  %s308_s18 = scalar_lea.vmem %s1923_s7, %s1541_s15  ;;  %s1579_s26 = smov 1  }
  0x10   : > { %v325_v6 = vsub.s32 %v322_v4, %v1636_v3  ;;  %v347_v14 = vcombine.high %v309_v8, %v309_v8  ;;  %v374_v23 = vsel %vm373_vm0, %v309_v8, %v349_v13  ;;  %vm404_vm9 = vmor %vm402_vm7, %vm403_vm8  ;;  %v847_v42 = vsub.s32 4, %v1636_v3  ;;  %s1582_s29 = smov 112   ;;  %v1377_v52 = vld [vmem:[%s1921_s5] sm:$0xff]  ;;  %s1540_s11 = sshll.u32 %s1925_s25, 4 }
  0x11   : > { %v317_v15 = vmin.f32 %v316_v11, 1.0  ;;  %v387_v30 = vsub.s32 %v384_v20, %v1636_v3  ;;  %v1583_v51 = vmov 0   ;;  %v1741_v53 = vand.u32 127, %v323_v0 }
  0x12   : > { %v326_v12 = vrot.slane %v310_v5, %v325_v6  ;;  %v375_v24 = vsel %vm373_vm0, %v347_v14, %v310_v5  ;;  %v852_v45 = vrot.slane %v1696_v43, %v847_v42  ;;  %v848_v46 = vrot.slane %v1701_v44, %v847_v42  ;;  %1562 = vset.pattern.permute.xlu0 %v1583_v51  ;;  %v1500_v14 = vld [vmem:[%s1920_s4 + $0x8] sm:$0xff] }
  0x13   : > { %vm318_vm1 = vcmp.gt.f32.partialorder %v317_v15, 0.05  ;;  %vm421_vm10 = vcmp.lt.s32.totalorder %v1741_v53, 17  ;;  %v429_v56 = vrot.slane %v1701_v44, %v1651_v18  ;;  %vm447_vm11 = vcmp.lt.s32.totalorder %v1741_v53, 16 }
  0x14   : > { %v336_v16 = vcombine.high %v326_v12, %v326_v12  ;;  %v333_v17 = vrot.slane %v326_v12, %v325_v6  ;;  %v455_v57 = vrot.slane %v1701_v44, %v1654_v19  ;;  %v459_v58 = vrot.slane %v1696_v43, %v1654_v19 }
  0x15   : > { %v433_v59 = vrot.slane %v1696_v43, %v1651_v18  ;;  %v642_v13 = vsub.s32 2, %v1636_v3  ;;  %vm466_vm12 = vcmask 72704   ;;  %vm635_vm13 = vcmp.lt.s32.totalorder %v1741_v53, 15 }
  0x16   : > { %v343_v21 = vrot.slane %v336_v16, %v325_v6  ;;  %v335_v22 = vsel %vm318_vm1, %v333_v17, 0.0  ;;  %vm744_vm14 = vcmp.lt.s32.totalorder %v1741_v53, 1  ;;  %vm949_vm15 = vcmp.lt.s32.totalorder %v1741_v53, 127 }
  0x17   : > { %v355_v26 = vrot.slane %v335_v22, %v1651_v18  ;;  %v359_v27 = vrot.slane %v335_v22, %v1654_v19  ;;  %v647_v22 = vrot.slane %v1696_v43, %v642_v13  ;;  %vm1058_vm0 = vcmp.lt.s32.totalorder %v1741_v53, 113 }
  0x18   : > { %v345_v25 = vsel %vm318_vm1, %v343_v21, 0.0  ;;  %v643_v21 = vrot.slane %v1701_v44, %v642_v13  ;;  %v1519_v13 = vld [vmem:[%s1920_s4 + $0x28] sm:$0xff]  ;;  %vm1167_vm1 = vcmp.lt.s32.totalorder %v1741_v53, 112 }
  0x19   : > { %v1659_v28 = vrot.slane %v345_v25, %v1651_v18  ;;  %v1662_v29 = vrot.slane %v345_v25, %v1654_v19  ;;  %v1665_v31 = vsel %vm376_vm2, %v374_v23, %v355_v26  ;;  %v1667_v32 = vsel %vm376_vm2, %v375_v24, %v359_v27  ;;  %v438_v23 = vld [vmem:[%s1920_s4] sm:$0xff] }
  0x1a   : > { %v381_v34 = vcombine.high %v1665_v31, %v1667_v32  ;;  %v1714_v49 = vmul.f32 %v852_v45, %v1667_v32  ;;  %v1717_v50 = vmul.f32 %v848_v46, %v1665_v31  ;;  %vm1276_vm2 = vcmp.lt.s32.totalorder %v1741_v53, 111 }
  0x1b   : > { %413 = vrot.lane.b32.xlu1 %v1659_v28, %s1575_s13  ;;  %441 = vrot.lane.b32.xlu0 %v1659_v28, %s1576_s14  ;;  %v390_v33 = vcombine.low %v1659_v28, %v1662_v29  ;;  %v1708_v47 = vmul.f32 %v852_v45, %v1662_v29  ;;  %v1711_v48 = vmul.f32 %v848_v46, %v1659_v28 }
  0x1c   : > { %v388_v36 = vrot.slane %v381_v34, %v387_v30 }
  0x1d   : > { %v397_v35 = vrot.slane %v390_v33, %v387_v30  ;;  %v751_v30 = vsub.s32 3, %v1636_v3 }
  0x1e   : > { %v389_v38 = vcombine.high %v388_v36, %v388_v36 }
  0x1f   : > { %417 = vrot.lane.b32.xlu1 %v1662_v29, %s1575_s13  ;;  %445 = vrot.lane.b32.xlu0 %v1662_v29, %s1576_s14  ;;  %v407_v37 = vrot.slane %v397_v35, 7 }
  0x20   : > { %v1499_v40 = vrot.slane %v389_v38, 9  ;;  %v756_v38 = vrot.slane %v1696_v43, %v751_v30 }
  0x22   : > { %v408_v41 = vsel %vm404_vm9, %v1499_v40, %v407_v37  ;;  %v752_v37 = vrot.slane %v1701_v44, %v751_v30  ;;  %v1507_v40 = vld [vmem:[%s1920_s4 + $0x10] sm:$0xff] }
  0x23   : > { %439 = vrot.lane.b32.xlu0 %v1665_v31, %s1576_s14  ;;  %443 = vrot.lane.b32.xlu1 %v1667_v32, %s1576_s14  ;;  %410 = vst [vmem:[%s308_s18] sm:$0xf] %v408_v41  ;;  %s303_s14 = scalar_lea.vmem %s1922_s6, %s1540_s11 }
  0x27   : > { %411 = vrot.lane.b32.xlu0 %v1665_v31, %s1575_s13  ;;  %415 = vrot.lane.b32.xlu1 %v1667_v32, %s1575_s13 }
  0x2b   : > { %629 = vrot.lane.b32.xlu0 %v1659_v28, %s1578_s19  ;;  %633 = vrot.lane.b32.xlu1 %v1662_v29, %s1578_s19 }
  0x2f   : > { %627 = vrot.lane.b32.xlu0 %v1665_v31, %s1578_s19  ;;  %631 = vrot.lane.b32.xlu1 %v1667_v32, %s1578_s19 }
  0x33   : > { %738 = vrot.lane.b32.xlu0 %v1659_v28, %s1579_s26  ;;  %742 = vrot.lane.b32.xlu1 %v1662_v29, %s1579_s26 }
  0x37   : > { %736 = vrot.lane.b32.xlu0 %v1665_v31, %s1579_s26  ;;  %740 = vrot.lane.b32.xlu1 %v1667_v32, %s1579_s26 }
  0x3b   : > { %943 = vrot.lane.b32.xlu0 %v1659_v28, %s1580_s27  ;;  %947 = vrot.lane.b32.xlu1 %v1662_v29, %s1580_s27 }
  0x3f   : > { %941 = vrot.lane.b32.xlu0 %v1665_v31, %s1580_s27  ;;  %945 = vrot.lane.b32.xlu1 %v1667_v32, %s1580_s27 }
  0x43   : > { %1052 = vrot.lane.b32.xlu0 %v1659_v28, %s1581_s28  ;;  %1056 = vrot.lane.b32.xlu1 %v1662_v29, %s1581_s28 }
  0x47   : > { %1050 = vrot.lane.b32.xlu0 %v1665_v31, %s1581_s28  ;;  %1054 = vrot.lane.b32.xlu1 %v1667_v32, %s1581_s28 }
  0x4b   : > { %1161 = vrot.lane.b32.xlu0 %v1659_v28, %s1582_s29  ;;  %1165 = vrot.lane.b32.xlu1 %v1662_v29, %s1582_s29 }
  0x4f   : > { %1159 = vrot.lane.b32.xlu0 %v1665_v31, %s1582_s29  ;;  %1163 = vrot.lane.b32.xlu1 %v1667_v32, %s1582_s29 }
  0x53   : > { %1270 = vrot.lane.b32.xlu0 %v1659_v28, %s1584_s30  ;;  %1274 = vrot.lane.b32.xlu1 %v1662_v29, %s1584_s30 }
  0x57   : > { %1268 = vrot.lane.b32.xlu0 %v1665_v31, %s1584_s30  ;;  %1272 = vrot.lane.b32.xlu1 %v1667_v32, %s1584_s30 }
  0x5b   : > { %1380 = vperm.xlu0 %1562, %v1377_v52  }
  0x8d   : > { %v414_v54 = vpop.permute.xlu1 %413  ;;  %v442_v55 = vpop.permute.xlu0 %441 }
  0x91   : > { %v418_v60 = vpop.permute.xlu1 %417  ;;  %v446_v61 = vpop.permute.xlu0 %445 }
  0x92   : > { %v423_v62 = vsel %vm421_vm10, %v414_v54, %v418_v60  ;;  %v425_v63 = vsel %vm421_vm10, %v418_v60, %v414_v54  ;;  %v449_v0 = vsel %vm447_vm11, %v442_v55, %v446_v61  ;;  %v451_v1 = vsel %vm447_vm11, %v446_v61, %v442_v55  ;;  %v1515_v55 = vld [vmem:[%s1920_s4 + $0x20] sm:$0xff] }
  0x93   : > { %v436_v2 = vmul.f32 %v429_v56, %v425_v63  ;;  %v462_v4 = vmul.f32 %v455_v57, %v451_v1  ;;  %v463_v5 = vmul.f32 %v459_v58, %v449_v0  ;;  %v437_v6 = vmul.f32 %v433_v59, %v423_v62 }
  0x94   : > { %v956_v54 = vsub.s32 5, %v1636_v3 }
  0x95   : > { %1501 = vmatprep.subr.msk.mxu0 %vm398_vm4, %v463_v5  ;;  %1504 = vmatprep.subr.msk.mxu1 %vm398_vm4, %v437_v6  ;;  %v440_v7 = vpop.permute.xlu0 %439  ;;  %v444_v8 = vpop.permute.xlu1 %443 }
  0x96   : > { %v448_v9 = vsel %vm447_vm11, %v440_v7, %v444_v8  ;;  %v450_v10 = vsel %vm447_vm11, %v444_v8, %v440_v7  ;;  %1502 = vmatpush1.msk.msra.mxu0 %vm398_vm4, %v462_v4  ;;  %1505 = vmatpush1.msk.msra.mxu1 %vm398_vm4, %v436_v2  ;;  %v957_v60 = vrot.slane %v1701_v44, %v956_v54  ;;  %v1065_v4 = vsub.s32 6, %v1636_v3 }
  0x97   : > { %v460_v11 = vmul.f32 %v455_v57, %v450_v10  ;;  %v461_v12 = vmul.f32 %v459_v58, %v448_v9  ;;  %v961_v61 = vrot.slane %v1696_v43, %v956_v54 }
  0x99   : > { %v412_v15 = vpop.permute.xlu0 %411  ;;  %506 = vmatprep.subr.mxu0 %v461_v12  ;;  %v416_v16 = vpop.permute.xlu1 %415  ;;  %v1070_v12 = vrot.slane %v1696_v43, %v1065_v4 }
  0x9a   : > { %v422_v17 = vsel %vm421_vm10, %v412_v15, %v416_v16  ;;  %v424_v18 = vsel %vm421_vm10, %v416_v16, %v412_v15  ;;  %507 = vmatpush1.msra.mxu0 %v460_v11  ;;  %v1066_v11 = vrot.slane %v1701_v44, %v1065_v4 }
  0x9b   : > { %v434_v19 = vmul.f32 %v429_v56, %v424_v18  ;;  %v435_v20 = vmul.f32 %v433_v59, %v422_v17  ;;  %1503 = vmatmul.mubr.msk.f32.vlgmr.msra.gmra.mxu0 %vm466_vm12, %v1500_v14 }
  0x9c   : > { %727 = vmatprep.mubr.f32.mxu0 %v1577_v39 }
  0x9d   : > { %v630_v24 = vpop.permute.xlu0 %629  ;;  %586 = vmatprep.subr.mxu1 %v435_v20  ;;  %v634_v25 = vpop.permute.xlu1 %633  ;;  %v1174_v20 = vsub.s32 7, %v1636_v3 }
  0x9e   : > { %v637_v26 = vsel %vm635_vm13, %v630_v24, %v634_v25  ;;  %v639_v27 = vsel %vm635_vm13, %v634_v25, %v630_v24  ;;  %587 = vmatpush1.msra.mxu1 %v434_v19 }
  0x9f   : > { %v650_v28 = vmul.f32 %v643_v21, %v639_v27  ;;  %v651_v29 = vmul.f32 %v647_v22, %v637_v26  ;;  %1506 = vmatmul.mubr.msk.f32.vlgmr.msra.gmra.mxu1 %vm466_vm12, %v438_v23  ;;  %v1175_v26 = vrot.slane %v1701_v44, %v1174_v20  ;;  %v1179_v27 = vrot.slane %v1696_v43, %v1174_v20 }
  0xa0   : > { %836 = vmatprep.mubr.f32.mxu1 %v1577_v39 }
  0xa1   : > { %v628_v31 = vpop.permute.xlu0 %627  ;;  %1508 = vmatprep.subr.msk.mxu0 %vm398_vm4, %v651_v29  ;;  %v632_v32 = vpop.permute.xlu1 %631 }
  0xa2   : > { %v636_v33 = vsel %vm635_vm13, %v628_v31, %v632_v32  ;;  %v638_v34 = vsel %vm635_vm13, %v632_v32, %v628_v31  ;;  %1509 = vmatpush1.msk.msra.mxu0 %vm398_vm4, %v650_v28  ;;  %v1523_v28 = vld [vmem:[%s1920_s4 + $0x30] sm:$0xff] }
  0xa3   : > { %v648_v35 = vmul.f32 %v643_v21, %v638_v34  ;;  %v649_v36 = vmul.f32 %v647_v22, %v636_v33 }
  0xa5   : > { %v739_v41 = vpop.permute.xlu0 %738  ;;  %693 = vmatprep.subr.mxu0 %v649_v36  ;;  %v743_v42 = vpop.permute.xlu1 %742 }
  0xa6   : > { %v746_v45 = vsel %vm744_vm14, %v739_v41, %v743_v42  ;;  %v748_v46 = vsel %vm744_vm14, %v743_v42, %v739_v41  ;;  %694 = vmatpush1.msra.mxu0 %v648_v35  ;;  %v1527_v41 = vld [vmem:[%s1920_s4 + $0x38] sm:$0xff] }
  0xa7   : > { %v759_v51 = vmul.f32 %v752_v37, %v748_v46  ;;  %v760_v52 = vmul.f32 %v756_v38, %v746_v45  ;;  %1516 = vmatprep.subr.msk.mxu0 %vm398_vm4, %v1708_v47  ;;  %1510 = vmatmul.mubr.msk.f32.vlgmr.msra.gmra.mxu0 %vm466_vm12, %v1507_v40  ;;  %v1532_v40 = vld [vmem:[%s1919_s3 + $0x18] ss:$0 sm:$0xff] }
  0xa8   : > { %1517 = vmatpush1.msk.msra.mxu0 %vm398_vm4, %v1711_v48  ;;  %932 = vmatprep.mubr.f32.mxu0 %v1577_v39 }
  0xa9   : > { %v737_v56 = vpop.permute.xlu0 %736  ;;  %1512 = vmatprep.subr.msk.mxu1 %vm398_vm4, %v760_v52  ;;  %v741_v57 = vpop.permute.xlu1 %740  ;;  %898 = vmatprep.subr.mxu0 %v1714_v49  ;;  %v1511_v49 = vld [vmem:[%s1920_s4 + $0x18] sm:$0xff] }
  0xaa   : > { %v745_v47 = vsel %vm744_vm14, %v737_v56, %v741_v57  ;;  %v747_v58 = vsel %vm744_vm14, %v741_v57, %v737_v56  ;;  %1513 = vmatpush1.msk.msra.mxu1 %vm398_vm4, %v759_v51  ;;  %899 = vmatpush1.msra.mxu0 %v1717_v50 }
  0xab   : > { %v757_v48 = vmul.f32 %v752_v37, %v747_v58  ;;  %v758_v59 = vmul.f32 %v756_v38, %v745_v47  ;;  %1518 = vmatmul.mubr.msk.f32.vlgmr.msra.gmra.mxu0 %vm466_vm12, %v1515_v55 }
  0xac   : > { %1150 = vmatprep.mubr.f32.mxu0 %v1577_v39 }
  0xad   : > { %v944_v62 = vpop.permute.xlu0 %943  ;;  %802 = vmatprep.subr.mxu1 %v758_v59  ;;  %v948_v63 = vpop.permute.xlu1 %947  ;;  %v1533_v59 = vld [vmem:[%s1920_s4 + $0x40] sm:$0xff] }
  0xae   : > { %v951_v50 = vsel %vm949_vm15, %v944_v62, %v948_v63  ;;  %v953_v0 = vsel %vm949_vm15, %v948_v63, %v944_v62  ;;  %803 = vmatpush1.msra.mxu1 %v757_v48 }
  0xaf   : > { %v964_v1 = vmul.f32 %v957_v60, %v951_v50  ;;  %v965_v2 = vmul.f32 %v961_v61, %v953_v0  ;;  %1514 = vmatmul.mubr.msk.f32.vlgmr.msra.gmra.mxu1 %vm466_vm12, %v1511_v49 }
  0xb0   : > { %1041 = vmatprep.mubr.f32.mxu1 %v1577_v39 }
  0xb1   : > { %v942_v5 = vpop.permute.xlu0 %941  ;;  %1520 = vmatprep.subr.msk.mxu1 %vm398_vm4, %v965_v2  ;;  %v946_v6 = vpop.permute.xlu1 %945 }
  0xb2   : > { %v950_v7 = vsel %vm949_vm15, %v942_v5, %v946_v6  ;;  %v952_v8 = vsel %vm949_vm15, %v946_v6, %v942_v5  ;;  %1521 = vmatpush1.msk.msra.mxu1 %vm398_vm4, %v964_v1 }
  0xb3   : > { %v962_v9 = vmul.f32 %v957_v60, %v950_v7  ;;  %v963_v10 = vmul.f32 %v961_v61, %v952_v8 }
  0xb5   : > { %v1053_v14 = vpop.permute.xlu0 %1052  ;;  %1007 = vmatprep.subr.mxu1 %v963_v10  ;;  %v1057_v15 = vpop.permute.xlu1 %1056 }
  0xb6   : > { %v1060_v16 = vsel %vm1058_vm0, %v1053_v14, %v1057_v15  ;;  %v1062_v17 = vsel %vm1058_vm0, %v1057_v15, %v1053_v14  ;;  %1008 = vmatpush1.msra.mxu1 %v962_v9 }
  0xb7   : > { %v1073_v18 = vmul.f32 %v1066_v11, %v1060_v16  ;;  %v1074_v19 = vmul.f32 %v1070_v12, %v1062_v17  ;;  %1522 = vmatmul.mubr.msk.f32.vlgmr.msra.gmra.mxu1 %vm466_vm12, %v1519_v13 }
  0xb8   : > { %1259 = vmatprep.mubr.f32.mxu1 %v1577_v39 }
  0xb9   : > { %v1051_v21 = vpop.permute.xlu0 %1050  ;;  %v1055_v22 = vpop.permute.xlu1 %1054  ;;  %1524 = vmatprep.subr.msk.mxu0 %vm398_vm4, %v1074_v19 }
  0xba   : > { %v1059_v23 = vsel %vm1058_vm0, %v1051_v21, %v1055_v22  ;;  %v1061_v24 = vsel %vm1058_vm0, %v1055_v22, %v1051_v21  ;;  %1525 = vmatpush1.msk.msra.mxu0 %vm398_vm4, %v1073_v18 }
  0xbb   : > { %v1071_v25 = vmul.f32 %v1066_v11, %v1059_v23  ;;  %v1072_v3 = vmul.f32 %v1070_v12, %v1061_v24 }
  0xbd   : > { %v1162_v29 = vpop.permute.xlu0 %1161  ;;  %v1166_v30 = vpop.permute.xlu1 %1165  ;;  %1116 = vmatprep.subr.mxu0 %v1072_v3 }
  0xbe   : > { %v1169_v31 = vsel %vm1167_vm1, %v1162_v29, %v1166_v30  ;;  %v1171_v32 = vsel %vm1167_vm1, %v1166_v30, %v1162_v29  ;;  %1117 = vmatpush1.msra.mxu0 %v1071_v25 }
  0xbf   : > { %v1182_v33 = vmul.f32 %v1175_v26, %v1169_v31  ;;  %v1183_v34 = vmul.f32 %v1179_v27, %v1171_v32  ;;  %1526 = vmatmul.mubr.msk.f32.vlgmr.msra.gmra.mxu0 %vm466_vm12, %v1523_v28 }
  0xc0   : > { %1368 = vmatprep.mubr.f32.mxu0 %v1577_v39  ;;  %v1531_v39 = vld [vmem:[%s1919_s3 + $0x10] ss:$0 sm:$0xff] }
  0xc1   : > { %v1160_v43 = vpop.permute.xlu0 %1159  ;;  %1528 = vmatprep.subr.msk.mxu1 %vm398_vm4, %v1183_v34  ;;  %v1164_v44 = vpop.permute.xlu1 %1163 }
  0xc2   : > { %v1168_v35 = vsel %vm1167_vm1, %v1160_v43, %v1164_v44  ;;  %v1170_v36 = vsel %vm1167_vm1, %v1164_v44, %v1160_v43  ;;  %1529 = vmatpush1.msk.msra.mxu1 %vm398_vm4, %v1182_v33 }
  0xc3   : > { %v1180_v37 = vmul.f32 %v1175_v26, %v1168_v35  ;;  %v1181_v38 = vmul.f32 %v1179_v27, %v1170_v36 }
  0xc5   : > { %v1271_v42 = vpop.permute.xlu0 %1270  ;;  %1225 = vmatprep.subr.mxu1 %v1181_v38  ;;  %v1275_v45 = vpop.permute.xlu1 %1274 }
  0xc6   : > { %v1278_v46 = vsel %vm1276_vm2, %v1271_v42, %v1275_v45  ;;  %v1280_v51 = vsel %vm1276_vm2, %v1275_v45, %v1271_v42  ;;  %1226 = vmatpush1.msra.mxu1 %v1180_v37 }
  0xc7   : > { %v1291_v52 = vmul.f32 %v1531_v39, %v1278_v46  ;;  %v1292_v54 = vmul.f32 %v1532_v40, %v1280_v51  ;;  %1530 = vmatmul.mubr.msk.f32.vlgmr.msra.gmra.mxu1 %vm466_vm12, %v1527_v41 }
  0xc9   : > { %v1269_v55 = vpop.permute.xlu0 %1268  ;;  %v1273_v56 = vpop.permute.xlu1 %1272  ;;  %1534 = vmatprep.subr.msk.mxu0 %vm398_vm4, %v1292_v54 }
  0xca   : > { %v1277_v57 = vsel %vm1276_vm2, %v1269_v55, %v1273_v56  ;;  %v1279_v47 = vsel %vm1276_vm2, %v1273_v56, %v1269_v55  ;;  %1535 = vmatpush1.msk.msra.mxu0 %vm398_vm4, %v1291_v52 }
  0xcb   : > { %v1289_v58 = vmul.f32 %v1531_v39, %v1277_v57  ;;  %v1290_v48 = vmul.f32 %v1532_v40, %v1279_v47 }
  0xcd   : > { %1334 = vmatprep.subr.mxu0 %v1290_v48 }
  0xce   : > { %1335 = vmatpush1.msra.mxu0 %v1289_v58 }
  0xcf   : > { %1536 = vmatmul.mubr.msk.f32.vlgmr.msra.gmra.mxu0 %vm466_vm12, %v1533_v59 }
  0xd6   : > { %v1381_v24 = vpop.permute.xlu0 %1380 }
 0x15b   : > { %v542_v60 = vpop.f32.mrf.mxu0 }
 0x15d   : > { %v544_v61 = vpop.f32.mrf.mxu0 }
 0x15f   : > { %v622_v49 = vpop.f32.mrf.mxu1 }
 0x160   : > { %v623_v50 = vadd.f32 %v622_v49, %v542_v60 }
 0x161   : > { %v624_v62 = vpop.f32.mrf.mxu1 }
 0x162   : > { %v625_v53 = vadd.f32 %v624_v62, %v544_v61 }
 0x167   : > { %v729_v63 = vpop.f32.mrf.mxu0 }
 0x168   : > { %v734_v2 = vadd.f32 %v729_v63, %v623_v50 }
 0x169   : > { %v731_v0 = vpop.f32.mrf.mxu0 }
 0x16a   : > { %v735_v4 = vadd.f32 %v731_v0, %v625_v53 }
 0x16b   : > { %v934_v6 = vpop.f32.mrf.mxu0 }
 0x16d   : > { %v936_v9 = vpop.f32.mrf.mxu0 }
 0x16f   : > { %v838_v1 = vpop.f32.mrf.mxu1 }
 0x170   : > { %v843_v7 = vadd.f32 %v838_v1, %v734_v2 }
 0x171   : > { %v840_v5 = vpop.f32.mrf.mxu1 }
 0x172   : > { %v844_v8 = vadd.f32 %v840_v5, %v735_v4  ;;  %v939_v11 = vadd.f32 %v934_v6, %v843_v7 }
 0x174   : > { %v940_v12 = vadd.f32 %v936_v9, %v844_v8 }
 0x177   : > { %v1043_v10 = vpop.f32.mrf.mxu1 }
 0x178   : > { %v1048_v15 = vadd.f32 %v1043_v10, %v939_v11 }
 0x179   : > { %v1045_v13 = vpop.f32.mrf.mxu1 }
 0x17a   : > { %v1049_v16 = vadd.f32 %v1045_v13, %v940_v12 }
 0x17f   : > { %v1152_v14 = vpop.f32.mrf.mxu0 }
 0x180   : > { %v1157_v19 = vadd.f32 %v1152_v14, %v1048_v15 }
 0x181   : > { %v1154_v17 = vpop.f32.mrf.mxu0 }
 0x182   : > { %v1158_v20 = vadd.f32 %v1154_v17, %v1049_v16 }
 0x187   : > { %v1261_v18 = vpop.f32.mrf.mxu1 }
 0x188   : > { %v1266_v22 = vadd.f32 %v1261_v18, %v1157_v19 }
 0x189   : > { %v1263_v21 = vpop.f32.mrf.mxu1 }
 0x18a   : > { %v1267_v25 = vadd.f32 %v1263_v21, %v1158_v20 }
 0x18f   : > { %v1370_v23 = vpop.f32.mrf.mxu0 }
 0x190   : > { %v1375_v3 = vadd.f32 %v1370_v23, %v1266_v22 }
 0x191   : > { %v1372_v26 = vpop.f32.mrf.mxu0 }
 0x192   : > { %v1383_v27 = vadd.f32 %v1381_v24, %v1375_v3  ;;  %v1376_v28 = vadd.f32 %v1372_v26, %v1267_v25 }
 0x194   : > { %1385 = vst [vmem:[%s303_s14] sm:$0xff] %v1383_v27  ;;  %v1384_v29 = vadd.f32 %v1381_v24, %v1376_v28 }
 0x196   : > { %1386 = vst [vmem:[%s303_s14 + $0x8] sm:$0xff] %v1384_v29 }
 0x197 PF: > { %s18_s24 = sadd.s32 1, %s1571_s24  }
 0x198   : > { %p15_p4 = scmp.ge.s32.totalorder %s18_s24, 4  }
 0x19a   :  { %17 = sbr.rel (!%p15_p4) target bundleno = 1 (0x1), region = 97 }

</bundles_post_ra>
